<compile_context>
chip_gen: v6e
topology: v6e:2x2x1
jax: 0.10.0
libtpu: 0.0.40
codegen_flags: <defaults>
</compile_context>

<pallas_src>
import jax
import jax.numpy as jnp
from jax import lax
from jax.experimental import pallas as pl
from jax.experimental.pallas import tpu as pltpu


def _round_up(x, m):
    return ((x + m - 1) // m) * m


# ---------------------------------------------------------------------------
# Fast path: clip_features table resident in VMEM (small tables).
# ---------------------------------------------------------------------------
def _labo_vmem_kernel(idx_ref, clip_ref, w_ref, b_ref, concepts_ref, preds_ref):
    # idx_ref      : (Bp,) int32, SMEM (scalar prefetch)
    # clip_ref     : (N, D) clip table, resident in VMEM (constant index_map)
    # w_ref        : (D, Cp) pre-transposed Linear weight, resident in VMEM
    # b_ref        : (1, Cp) bias, resident in VMEM
    # concepts_ref : (tb, D) output block
    # preds_ref    : (tb, Cp) output block
    tb = concepts_ref.shape[0]
    base = pl.program_id(0) * tb

    # Gather rows directly into the concepts output block (it doubles as the
    # matmul LHS), so there is no scratch buffer and no extra tile copy.
    def gather(r, carry):
        concepts_ref[pl.ds(r, 1), :] = clip_ref[pl.ds(idx_ref[base + r], 1), :]
        return carry

    lax.fori_loop(0, tb, gather, 0, unroll=8)

    c = concepts_ref[...]                                  # (tb, D)
    y = jnp.dot(c, w_ref[...], preferred_element_type=jnp.float32)
    preds_ref[...] = (y + b_ref[...]).astype(preds_ref.dtype)


# ---------------------------------------------------------------------------
# Large-table path: table in HBM, double-buffered row-gather DMAs.
# ---------------------------------------------------------------------------
def _labo_hbm_kernel(idx_ref, clip_hbm, w_ref, b_ref, concepts_ref, preds_ref,
                     rows, sem):
    # rows : (2, tb, D) VMEM scratch (double-buffered gathered rows)
    # sem  : DMA semaphores, shape (2,) -- one per slot
    tb = rows.shape[1]
    i = pl.program_id(0)
    nb = pl.num_programs(0)
    slot = i & 1

    def issue_tile(tile, dst_slot):
        base = tile * tb

        def body(r, carry):
            pltpu.make_async_copy(
                clip_hbm.at[pl.ds(idx_ref[base + r], 1), :],
                rows.at[dst_slot, pl.ds(r, 1), :],
                sem.at[dst_slot],
            ).start()
            return carry

        lax.fori_loop(0, tb, body, 0, unroll=8)

    # Cold start: prime slot 0 with tile 0's rows (only on the first grid step).
    @pl.when(i == 0)
    def _():
        issue_tile(0, 0)

    # Prefetch tile i+1 into the other slot BEFORE blocking on tile i.
    # (All SMEM index reads happen before the wait, as recommended.)
    @pl.when(i + 1 < nb)
    def _():
        issue_tile(i + 1, 1 - slot)

    # Single aggregate wait: tb row copies of D elements each == one (tb, D) block
    # on this slot's semaphore.
    pltpu.make_async_copy(rows.at[slot], rows.at[slot], sem.at[slot]).wait()

    c = rows[slot]                                         # (tb, D)
    concepts_ref[...] = c.astype(concepts_ref.dtype)
    y = jnp.dot(c, w_ref[...], preferred_element_type=jnp.float32)
    preds_ref[...] = (y + b_ref[...]).astype(preds_ref.dtype)


# ---------------------------------------------------------------------------
# Wrapper
# ---------------------------------------------------------------------------
def labo_forward(x_idx, clip_features, W_g, b_g, *, tb=256,
                 vmem_table_budget_bytes=4 << 20, force_hbm_gather=False):
    """x_idx: (B,) int indices; clip_features: (N, D); W_g: (C, D); b_g: (C,)."""
    B = int(x_idx.shape[0])
    N, D = clip_features.shape
    C, Din = W_g.shape
    assert Din == D, "W_g must be (num_classes, concept_dim)"

    x_idx = x_idx.astype(jnp.int32)

    # Batch tile: multiple of 8 sublanes, never larger than the rounded-up batch.
    # (On v7x, pick tb so that cdiv(B, tb) >= 2 if you want both TensorCores busy
    #  on the fast path.)
    tb = max(8, min(int(tb), _round_up(B, 8)))
    tb = _round_up(tb, 8)
    nb = -(-B // tb)
    Bp = nb * tb
    if Bp != B:
        # Pad with a valid row index (0); the partial last output block is masked
        # by Pallas when written back to HBM.
        x_idx = jnp.pad(x_idx, (0, Bp - B))

    # Lane-dense preds: pad the class dim to a multiple of 128 (zero weight/bias
    # columns), slice back after the call.
    Cp = _round_up(C, 128)
    Wp = jnp.pad(W_g, ((0, Cp - C), (0, 0))) if Cp != C else W_g
    bp = jnp.pad(b_g, (0, Cp - C)) if Cp != C else b_g
    Wt = Wp.T                      # one-time transpose -> canonical (K=D, N=Cp)
    b2 = bp.reshape(1, Cp)

    feat_dt = clip_features.dtype
    feat_bytes = jnp.dtype(feat_dt).itemsize
    table_bytes = N * D * feat_bytes
    use_vmem_table = (not force_hbm_gather) and table_bytes <= vmem_table_budget_bytes

    out_shape = (jax.ShapeDtypeStruct((B, D), feat_dt),
                 jax.ShapeDtypeStruct((B, Cp), jnp.float32))
    out_specs = [pl.BlockSpec((tb, D), lambda i, idx: (i, 0)),
                 pl.BlockSpec((tb, Cp), lambda i, idx: (i, 0))]
    w_spec = pl.BlockSpec((D, Cp), lambda i, idx: (0, 0))   # resident in VMEM
    b_spec = pl.BlockSpec((1, Cp), lambda i, idx: (0, 0))   # resident in VMEM

    cost = pl.CostEstimate(
        flops=2 * Bp * D * Cp,
        transcendentals=0,
        bytes_accessed=(Bp * D + Bp * D) * feat_bytes + (D * Cp + Bp * Cp + Cp) * 4,
    )

    # Explicit VMEM budget: resident weight/bias (double-buffered by default) +
    # double-buffered output blocks + gather buffers (or resident table), with
    # headroom.  Clamped to the smallest physical VMEM across generations (v7x).
    need = (2 * D * Cp * 4 + 2 * Cp * 4
            + 2 * tb * D * feat_bytes + 2 * tb * Cp * 4
            + (2 * table_bytes if use_vmem_table else 2 * tb * D * feat_bytes))
    vmem_limit = int(min(max(2 * need, 16 << 20), 64 << 20))

    if use_vmem_table:
        grid_spec = pltpu.PrefetchScalarGridSpec(
            num_scalar_prefetch=1,                               # x_idx -> SMEM
            grid=(nb,),
            in_specs=[pl.BlockSpec((N, D), lambda i, idx: (0, 0)),  # table in VMEM
                      w_spec, b_spec],
            out_specs=out_specs,
        )
        compiler_params = pltpu.CompilerParams(
            dimension_semantics=("parallel",),
            vmem_limit_bytes=vmem_limit)
        kernel = _labo_vmem_kernel
    else:
        grid_spec = pltpu.PrefetchScalarGridSpec(
            num_scalar_prefetch=1,                               # x_idx -> SMEM
            grid=(nb,),
            in_specs=[pl.BlockSpec(memory_space=pl.ANY),         # table stays in HBM
                      w_spec, b_spec],
            out_specs=out_specs,
            scratch_shapes=[
                pltpu.VMEM((2, tb, D), feat_dt),                 # double-buffered rows
                pltpu.SemaphoreType.DMA((2,)),                   # one sem per slot
            ],
        )
        # Cross-step prefetch carries state in scratch across grid steps, so this
        # axis must execute sequentially -> "arbitrary", not "parallel".
        compiler_params = pltpu.CompilerParams(
            dimension_semantics=("arbitrary",),
            vmem_limit_bytes=vmem_limit)
        kernel = _labo_hbm_kernel

    concepts, preds = pl.pallas_call(
        kernel,
        out_shape=out_shape,
        grid_spec=grid_spec,
        compiler_params=compiler_params,
        cost_estimate=cost,
    )(x_idx, clip_features, Wt, b2)

    if Cp != C:
        preds = preds[:, :C]

    return {
        "unnormalized_concepts": concepts,
        "concepts": concepts,   # proj_c = concepts (identity projection in this module)
        "preds": preds,
    }


if __name__ == "__main__":
    key = jax.random.PRNGKey(0)
    k1, k2, k3, k4 = jax.random.split(key, 4)

    # small shapes: N clip rows, D concept dim, C classes, B batch
    N, D, C, B = 64, 128, 10, 20

    clip_features = jax.random.normal(k1, (N, D), dtype=jnp.float32)
    W_g = jax.random.normal(k2, (C, D), dtype=jnp.float32) * 0.05
    b_g = jax.random.normal(k3, (C,), dtype=jnp.float32) * 0.01
    x_idx = jax.random.randint(k4, (B,), 0, N, dtype=jnp.int32)

    # plain-JAX reference of the torch forward
    ref_concepts = clip_features[x_idx]
    ref_preds = ref_concepts @ W_g.T + b_g

    # tb=8 keeps the demo small while exercising a multi-step grid (20 rows -> 3
    # tiles, incl. a partial last tile and the cross-step prefetch in the HBM path).
    out_fast = labo_forward(x_idx, clip_features, W_g, b_g, tb=8)
    jax.block_until_ready(out_fast)

    out_hbm = labo_forward(x_idx, clip_features, W_g, b_g, tb=8,
                           force_hbm_gather=True)
    jax.block_until_ready(out_hbm)

    for out in (out_fast, out_hbm):
        assert jnp.allclose(out["unnormalized_concepts"], ref_concepts, atol=1e-5)
        assert jnp.allclose(out["concepts"], ref_concepts, atol=1e-5)
        assert jnp.allclose(out["preds"], ref_preds, atol=1e-3)

    print("KERNEL_OK")
</pallas_src>

<mosaic_0001>
module attributes {stable_mosaic.version = 11 : i64} {
  func.func @_labo_vmem_kernel(%arg0: i32, %arg1: memref<24xi32, #tpu.memory_space<smem>>, %arg2: memref<64x128xf32, #tpu.memory_space<vmem>>, %arg3: memref<128x128xf32, #tpu.memory_space<vmem>>, %arg4: memref<1x128xf32, #tpu.memory_space<vmem>>, %arg5: memref<8x128xf32, #tpu.memory_space<vmem>>, %arg6: memref<8x128xf32, #tpu.memory_space<vmem>>) attributes {dimension_semantics = [#tpu.dimension_semantics<parallel>], iteration_bounds = array<i64: 3>, scalar_prefetch = 1 : i64, scratch_operands = 0 : i64, tpu.core_type = #tpu.core_type<tc>, window_params = [{pipeline_mode = #tpu.pipeline_mode<synchronous>, transform_indices = @transform_0, window_bounds = array<i64: 64, 128>}, {pipeline_mode = #tpu.pipeline_mode<synchronous>, transform_indices = @transform_1, window_bounds = array<i64: 128, 128>}, {pipeline_mode = #tpu.pipeline_mode<synchronous>, transform_indices = @transform_2, window_bounds = array<i64: 1, 128>}, {transform_indices = @transform_3, window_bounds = array<i64: 8, 128>}, {transform_indices = @transform_4, window_bounds = array<i64: 8, 128>}]} {
    %c8_i32 = arith.constant 8 : i32
    %0 = arith.muli %arg0, %c8_i32 : i32
    %c0_i32 = arith.constant 0 : i32
    %1 = arith.addi %0, %c0_i32 : i32
    %2 = arith.index_cast %1 : i32 to index
    %3 = memref.load %arg1[%2] : memref<24xi32, #tpu.memory_space<smem>>
    %4 = arith.index_cast %3 : i32 to index
    %c0 = arith.constant 0 : index
    %5 = vector.load %arg2[%4, %c0] : memref<64x128xf32, #tpu.memory_space<vmem>>, vector<1x128xf32>
    %6 = arith.index_cast %c0_i32 : i32 to index
    %c0_0 = arith.constant 0 : index
    %7 = vector.load %arg5[%6, %c0_0] : memref<8x128xf32, #tpu.memory_space<vmem>>, vector<1x128xf32>
    tpu.vector_store %arg5[%6, %c0_0], %5 {strides = array<i32>} : memref<8x128xf32, #tpu.memory_space<vmem>>, vector<1x128xf32>,
    %c1_i32 = arith.constant 1 : i32
    %8 = arith.addi %0, %c1_i32 : i32
    %9 = arith.index_cast %8 : i32 to index
    %10 = memref.load %arg1[%9] : memref<24xi32, #tpu.memory_space<smem>>
    %11 = arith.index_cast %10 : i32 to index
    %c0_1 = arith.constant 0 : index
    %12 = vector.load %arg2[%11, %c0_1] : memref<64x128xf32, #tpu.memory_space<vmem>>, vector<1x128xf32>
    %13 = arith.index_cast %c1_i32 : i32 to index
    %c0_2 = arith.constant 0 : index
    %14 = vector.load %arg5[%13, %c0_2] : memref<8x128xf32, #tpu.memory_space<vmem>>, vector<1x128xf32>
    tpu.vector_store %arg5[%13, %c0_2], %12 {strides = array<i32>} : memref<8x128xf32, #tpu.memory_space<vmem>>, vector<1x128xf32>,
    %c2_i32 = arith.constant 2 : i32
    %15 = arith.addi %0, %c2_i32 : i32
    %16 = arith.index_cast %15 : i32 to index
    %17 = memref.load %arg1[%16] : memref<24xi32, #tpu.memory_space<smem>>
    %18 = arith.index_cast %17 : i32 to index
    %c0_3 = arith.constant 0 : index
    %19 = vector.load %arg2[%18, %c0_3] : memref<64x128xf32, #tpu.memory_space<vmem>>, vector<1x128xf32>
    %20 = arith.index_cast %c2_i32 : i32 to index
    %c0_4 = arith.constant 0 : index
    %21 = vector.load %arg5[%20, %c0_4] : memref<8x128xf32, #tpu.memory_space<vmem>>, vector<1x128xf32>
    tpu.vector_store %arg5[%20, %c0_4], %19 {strides = array<i32>} : memref<8x128xf32, #tpu.memory_space<vmem>>, vector<1x128xf32>,
    %c3_i32 = arith.constant 3 : i32
    %22 = arith.addi %0, %c3_i32 : i32
    %23 = arith.index_cast %22 : i32 to index
    %24 = memref.load %arg1[%23] : memref<24xi32, #tpu.memory_space<smem>>
    %25 = arith.index_cast %24 : i32 to index
    %c0_5 = arith.constant 0 : index
    %26 = vector.load %arg2[%25, %c0_5] : memref<64x128xf32, #tpu.memory_space<vmem>>, vector<1x128xf32>
    %27 = arith.index_cast %c3_i32 : i32 to index
    %c0_6 = arith.constant 0 : index
    %28 = vector.load %arg5[%27, %c0_6] : memref<8x128xf32, #tpu.memory_space<vmem>>, vector<1x128xf32>
    tpu.vector_store %arg5[%27, %c0_6], %26 {strides = array<i32>} : memref<8x128xf32, #tpu.memory_space<vmem>>, vector<1x128xf32>,
    %c4_i32 = arith.constant 4 : i32
    %29 = arith.addi %0, %c4_i32 : i32
    %30 = arith.index_cast %29 : i32 to index
    %31 = memref.load %arg1[%30] : memref<24xi32, #tpu.memory_space<smem>>
    %32 = arith.index_cast %31 : i32 to index
    %c0_7 = arith.constant 0 : index
    %33 = vector.load %arg2[%32, %c0_7] : memref<64x128xf32, #tpu.memory_space<vmem>>, vector<1x128xf32>
    %34 = arith.index_cast %c4_i32 : i32 to index
    %c0_8 = arith.constant 0 : index
    %35 = vector.load %arg5[%34, %c0_8] : memref<8x128xf32, #tpu.memory_space<vmem>>, vector<1x128xf32>
    tpu.vector_store %arg5[%34, %c0_8], %33 {strides = array<i32>} : memref<8x128xf32, #tpu.memory_space<vmem>>, vector<1x128xf32>,
    %c5_i32 = arith.constant 5 : i32
    %36 = arith.addi %0, %c5_i32 : i32
    %37 = arith.index_cast %36 : i32 to index
    %38 = memref.load %arg1[%37] : memref<24xi32, #tpu.memory_space<smem>>
    %39 = arith.index_cast %38 : i32 to index
    %c0_9 = arith.constant 0 : index
    %40 = vector.load %arg2[%39, %c0_9] : memref<64x128xf32, #tpu.memory_space<vmem>>, vector<1x128xf32>
    %41 = arith.index_cast %c5_i32 : i32 to index
    %c0_10 = arith.constant 0 : index
    %42 = vector.load %arg5[%41, %c0_10] : memref<8x128xf32, #tpu.memory_space<vmem>>, vector<1x128xf32>
    tpu.vector_store %arg5[%41, %c0_10], %40 {strides = array<i32>} : memref<8x128xf32, #tpu.memory_space<vmem>>, vector<1x128xf32>,
    %c6_i32 = arith.constant 6 : i32
    %43 = arith.addi %0, %c6_i32 : i32
    %44 = arith.index_cast %43 : i32 to index
    %45 = memref.load %arg1[%44] : memref<24xi32, #tpu.memory_space<smem>>
    %46 = arith.index_cast %45 : i32 to index
    %c0_11 = arith.constant 0 : index
    %47 = vector.load %arg2[%46, %c0_11] : memref<64x128xf32, #tpu.memory_space<vmem>>, vector<1x128xf32>
    %48 = arith.index_cast %c6_i32 : i32 to index
    %c0_12 = arith.constant 0 : index
    %49 = vector.load %arg5[%48, %c0_12] : memref<8x128xf32, #tpu.memory_space<vmem>>, vector<1x128xf32>
    tpu.vector_store %arg5[%48, %c0_12], %47 {strides = array<i32>} : memref<8x128xf32, #tpu.memory_space<vmem>>, vector<1x128xf32>,
    %c7_i32 = arith.constant 7 : i32
    %50 = arith.addi %0, %c7_i32 : i32
    %51 = arith.index_cast %50 : i32 to index
    %52 = memref.load %arg1[%51] : memref<24xi32, #tpu.memory_space<smem>>
    %53 = arith.index_cast %52 : i32 to index
    %c0_13 = arith.constant 0 : index
    %54 = vector.load %arg2[%53, %c0_13] : memref<64x128xf32, #tpu.memory_space<vmem>>, vector<1x128xf32>
    %55 = arith.index_cast %c7_i32 : i32 to index
    %c0_14 = arith.constant 0 : index
    %56 = vector.load %arg5[%55, %c0_14] : memref<8x128xf32, #tpu.memory_space<vmem>>, vector<1x128xf32>
    tpu.vector_store %arg5[%55, %c0_14], %54 {strides = array<i32>} : memref<8x128xf32, #tpu.memory_space<vmem>>, vector<1x128xf32>,
    %c8_i32_15 = arith.constant 8 : i32
    %c0_16 = arith.constant 0 : index
    %c0_17 = arith.constant 0 : index
    %57 = vector.load %arg5[%c0_16, %c0_17] : memref<8x128xf32, #tpu.memory_space<vmem>>, vector<8x128xf32>
    %c0_18 = arith.constant 0 : index
    %c0_19 = arith.constant 0 : index
    %58 = vector.load %arg3[%c0_18, %c0_19] : memref<128x128xf32, #tpu.memory_space<vmem>>, vector<128x128xf32>
    %cst = arith.constant dense<0.000000e+00> : vector<8x128xf32>
    %59 = tpu.matmul %57, %58, %cst {dimension_numbers = #tpu.dot_dimension_numbers<[1], [0], [0], [1], [0, 0, 1, 1], [], []>} : vector<8x128xf32>, vector<128x128xf32>, vector<8x128xf32> -> vector<8x128xf32>
    %c0_20 = arith.constant 0 : index
    %c0_21 = arith.constant 0 : index
    %60 = vector.load %arg4[%c0_20, %c0_21] : memref<1x128xf32, #tpu.memory_space<vmem>>, vector<1x128xf32>
    %61 = vector.broadcast %60 : vector<1x128xf32> to vector<8x128xf32>
    %62 = arith.addf %59, %61 : vector<8x128xf32>
    %c0_22 = arith.constant 0 : index
    %c0_23 = arith.constant 0 : index
    %63 = vector.load %arg6[%c0_22, %c0_23] : memref<8x128xf32, #tpu.memory_space<vmem>>, vector<8x128xf32>
    tpu.vector_store %arg6[%c0_22, %c0_23], %62 {strides = array<i32>} : memref<8x128xf32, #tpu.memory_space<vmem>>, vector<8x128xf32>,
    return
  }
  func.func @transform_0(%arg0: i32, %arg1: memref<24xi32, #tpu.memory_space<smem>>) -> (i32, i32) {
    %c0_i32 = arith.constant 0 : i32
    %c0_i32_0 = arith.constant 0 : i32
    %c0_i32_1 = arith.constant 0 : i32
    return %c0_i32, %c0_i32_0 : i32, i32
  }
  func.func @transform_1(%arg0: i32, %arg1: memref<24xi32, #tpu.memory_space<smem>>) -> (i32, i32) {
    %c0_i32 = arith.constant 0 : i32
    %c0_i32_0 = arith.constant 0 : i32
    %c0_i32_1 = arith.constant 0 : i32
    return %c0_i32, %c0_i32_0 : i32, i32
  }
  func.func @transform_2(%arg0: i32, %arg1: memref<24xi32, #tpu.memory_space<smem>>) -> (i32, i32) {
    %c0_i32 = arith.constant 0 : i32
    %c0_i32_0 = arith.constant 0 : i32
    %c0_i32_1 = arith.constant 0 : i32
    return %c0_i32, %c0_i32_0 : i32, i32
  }
  func.func @transform_3(%arg0: i32, %arg1: memref<24xi32, #tpu.memory_space<smem>>) -> (i32, i32) {
    %c0_i32 = arith.constant 0 : i32
    %c0_i32_0 = arith.constant 0 : i32
    return %arg0, %c0_i32 : i32, i32
  }
  func.func @transform_4(%arg0: i32, %arg1: memref<24xi32, #tpu.memory_space<smem>>) -> (i32, i32) {
    %c0_i32 = arith.constant 0 : i32
    %c0_i32_0 = arith.constant 0 : i32
    return %arg0, %c0_i32 : i32, i32
  }
}

</mosaic_0001>

<bundles_post_ra>
// kernel: tpu_custom_call.1
= control target key start
LH: loop header
LB: loop body
LE: loop exit
PB: predicated region body
PF: predicated region fallthrough
CT: control target
= control target key end

     0   :  { %s799_s18 = smov [#allocation3]   ;;  %s1049_s0 = inlined_call_operand.hbm [shape: s32[24], index: 0, kind: input, shape index: {}]   ;;  %s1050_s1 = inlined_call_operand.hbm [shape: f32[64,128], index: 1, kind: input, shape index: {}]   ;;  %s1051_s2 = inlined_call_operand.hbm [shape: f32[128,128], index: 2, kind: input, shape index: {}]   ;;  %s1052_s3 = inlined_call_operand.vmem [shape: f32[1,128], index: 3, kind: input, shape index: {}]   ;;  %s1053_s4 = inlined_call_operand.hbm [shape: f32[20,128], index: 4, kind: output, shape index: {0}]   ;;  %s1054_s5 = inlined_call_operand.hbm [shape: f32[20,128], index: 5, kind: output, shape index: {1}]  }
   0x1   :  { %12 = dma.hbm_to_smem %s1049_s0, 16, %s799_s18, [#allocation2] }
   0x2   :  { %765 = dma.done.wait [#allocation2], 16 }
   0x3   :  { %766 = vsyncadd [#allocation2], 4294967280 }
   0x4   :  { %14 = sfence }
   0x5   :  { %15 = vsyncpa [#allocation5], 0 }
   0x6   :  { %16 = vsyncpa [#allocation8], 0 }
   0x7   :  { %17 = vsyncpa [#allocation6], 0 }
   0x8   :  { %19 = vsyncpa [#allocation6 + $0x1], 0 }
   0x9   :  { %20 = vsyncpa [#allocation11], 0 }
   0xa   :  { %22 = vsyncpa [#allocation11 + $0x1], 0  ;;  %s841_s21 = smov 0   ;;  %s843_s22 = smov 0  }
   0xb   :  { %s845_s23 = smov 0   ;;  %s847_s24 = smov 0  }
   0xc LB: > { %s862_s0 = sadd.s32 4294967295, %s797_s24   ;;  %s498_s25 = sadd.s32 4294967294, %s797_s24   ;;  %s797_s24 = sphi %s847_s24, %s1068_s24   ;;  %s793_s23 = sphi %s845_s23, %s1067_s23   ;;  %s789_s22 = sphi %s843_s22, %s1066_s22   ;;  %s785_s21 = sphi %s841_s21, %s1065_s21  }
   0xd   : > { %s866_s26 = sadd.s32 1, %s797_s24   ;;  %s98_s27 = sadd.s32 1, %s793_s23 }
   0xe   : > { %s95_s28 = ssub.s32 %s797_s24, %s866_s26  ;;  %p108_p0 = scmp.ne.s32.totalorder %s793_s23, %s789_s22 }
   0xf   : > { %p96_p1 = scmp.eq.s32.totalorder %s95_s28, 0  ;;  %p109_p2 = scmp.eq.s32.totalorder %s862_s0, 2 }
  0x10   : > { %p114_p3 = scmp.ne.s32.totalorder %s789_s22, %s785_s21  ;;  %p115_p4 = scmp.eq.s32.totalorder %s498_s25, 2 }
  0x11   : > { %s877_s29 = scalar_select %p96_p1, %s793_s23, %s98_s27  }
  0x12   : > { %p879_p5 = por %p109_p2, %p108_p0  ;;  %p883_p6 = por %p115_p4, %p114_p3 }
  0x13   : > { %p499_p7 = scmp.ge.s32.totalorder %s797_s24, 1  ;;  %p148_p8 = scmp.lt.s32.totalorder %s797_s24, 4 }
  0x14   : > { %s1057_s6 = scalar_select %p883_p6, 1, 0 }
  0x15   : > { %p1055_p9 = scmp.eq.s32.totalorder %s862_s0, 0  ;;  %p890_p10 = pnand %p499_p7, %p148_p8 }
  0x16   : > { %s800_s8 = smov [#allocation4]   ;;  %s801_s11 = smov [#allocation7]  }
  0x17   : > { %s160_s9 = sshll.u32 %s800_s8, 4  ;;  %p579_p11 = pneg %p890_p10  ;;  %s161_s9 = int_to_ptr.vmem [resolvable:$true] %s160_s9 }
  0x18   : > { %s173_s12 = sshll.u32 %s801_s11, 4  ;;  %s656_s13 = scalar_lea.vmem %s161_s9, 1024  ;;  %s174_s12 = int_to_ptr.vmem [resolvable:$true] %s173_s12 }
  0x19   : > { %p898_p12 = pnand %p1055_p9, %p579_p11  ;;  %p657_p0 = scmp.ne.s32.totalorder %s161_s9, %s656_s13 }
  0x1a   : > { %p664_p3 = scmp.lt.s32.totalorder %s161_s9, %s161_s9  ;;  %p665_p4 = scmp.lt.s32.totalorder %s656_s13, %s656_s13 }
  0x1b   : > { %p647_p13 = pneg %p898_p12 }
  0x1c   : > { %p666_p7 = por %p665_p4, %p664_p3 }
  0x1d   : > { %p659_p1 = pnand %p657_p0, %p647_p13 }
  0x1f   : > { %p660_p2 = pneg %p659_p1 }
  0x21   : > { %p667_p8 = pnand %p666_p7, %p660_p2 }
  0x23   : > { %670 = shalt.err (!%p667_p8)
}
  0x24   : > { %s802_s14 = smov 128   ;;  %s803_s15 = smov 8  }
  0x25   : > { %582 = dma.hbm_to_vmem [thread:$0]  (!%p898_p12), %s1050_s1, 1024, %s161_s9, [#allocation5], %s802_s14, %s802_s14, %s803_s15  }
  0x26   : > { %s682_s18 = scalar_lea.vmem %s174_s12, 2048  ;;  %p690_p9 = scmp.lt.s32.totalorder %s174_s12, %s174_s12 }
  0x27   : > { %p683_p11 = scmp.ne.s32.totalorder %s174_s12, %s682_s18  ;;  %p691_p6 = scmp.lt.s32.totalorder %s682_s18, %s682_s18 }
  0x29   : > { %p685_p0 = pnand %p683_p11, %p647_p13  ;;  %p692_p3 = por %p691_p6, %p690_p9 }
  0x2b   : > { %p686_p1 = pneg %p685_p0 }
  0x2d   : > { %p693_p2 = pnand %p692_p3, %p686_p1 }
  0x2f   : > { %696 = shalt.err (!%p693_p2)
}
  0x30   : > { %585 = dma.hbm_to_vmem [thread:$0]  (!%p898_p12), %s1051_s2, 2048, %s174_s12, [#allocation8], %s802_s14, %s802_s14, %s803_s15  }
  0x31   : > { %192 = sbr.rel (%p890_p10) target bundleno = 299 (0x12b), region = 32  ;;  %p1060_p4 = scmp.eq.s32.totalorder (!%p890_p10), %s862_s0, 0 }
  0x36   : > { %768 = dma.done.wait (%p1060_p4), [#allocation5], 1024   ;;  %p1061_p13 = pmov %p1060_p4 }
  0x37   : > { %p1062_p7 = pmov %p1060_p4 }
  0x38   : > { %770 = vsyncadd (%p1061_p13), [#allocation5], 4294966272 }
  0x39   : > { %772 = dma.done.wait (%p1062_p7), [#allocation8], 2048   ;;  %p1063_p6 = pmov %p1060_p4 }
  0x3a   : > { %s931_s25 = sand.u32 1, %s789_s22   ;;  %s507_s27 = sshll.u32 %s862_s0, 3  ;;  %v804_v0 = vmov 0.0   ;;  %vm805_vm0 = vmmov 0   ;;  %v278_v1 = vld [vmem:[#allocation7 + $0x78] sm:$0xff]  ;;  %v277_v2 = vld [vmem:[#allocation7 + $0x70] sm:$0xff] }
  0x3b   : > { %774 = vsyncadd (%p1063_p6), [#allocation8], 4294965248  ;;  %532 = vmatprep.subr.mxu0 %v804_v0  ;;  %564 = vmatprep.mubr.msk.f32.mxu0 %vm805_vm0, %v804_v0  ;;  %s505_s28 = sshll.u32 %s931_s25, 3  ;;  %s223_s7 = sld [smem:[#allocation3 + %s507_s27]]  ;;  %v276_v3 = vld [vmem:[#allocation7 + $0x68] sm:$0xff]  ;;  %v275_v4 = vld [vmem:[#allocation7 + $0x60] sm:$0xff] }
  0x3c   : > { %s227_s8 = sadd.s32 1, %s507_s27  ;;  %s232_s10 = sadd.s32 2, %s507_s27  ;;  %533 = vmatpush3.msra.mxu0 %v278_v1  ;;  %v274_v5 = vld [vmem:[#allocation7 + $0x58] sm:$0xff]  ;;  %v273_v11 = vld [vmem:[#allocation7 + $0x50] sm:$0xff]  ;;  %v272_v14 = vld [vmem:[#allocation7 + $0x48] sm:$0xff] }
  0x3d   : > { %s228_s9 = sld [smem:[#allocation3 + %s227_s8]]  ;;  %s237_s12 = sadd.s32 3, %s507_s27  ;;  %534 = vmatprep.subr.mxu0 %v804_v0  ;;  %v271_v16 = vld [vmem:[#allocation7 + $0x40] sm:$0xff]  ;;  %v270_v17 = vld [vmem:[#allocation7 + $0x38] sm:$0xff]  ;;  %v269_v18 = vld [vmem:[#allocation7 + $0x30] sm:$0xff] }
  0x3e   : > { %s937_s11 = sld [smem:[#allocation3 + %s232_s10]]  ;;  %s242_s14 = sadd.s32 4, %s507_s27  ;;  %535 = vmatpush3.msra.mxu0 %v277_v2  ;;  %v268_v19 = vld [vmem:[#allocation7 + $0x28] sm:$0xff]  ;;  %v267_v20 = vld [vmem:[#allocation7 + $0x20] sm:$0xff]  ;;  %v266_v21 = vld [vmem:[#allocation7 + $0x18] sm:$0xff] }
  0x3f   : > { %s939_s13 = sld [smem:[#allocation3 + %s237_s12]]  ;;  %s247_s16 = sadd.s32 5, %s507_s27  ;;  %536 = vmatprep.subr.mxu0 %v804_v0  ;;  %v265_v22 = vld [vmem:[#allocation7 + $0x10] sm:$0xff]  ;;  %v264_v23 = vld [vmem:[#allocation7 + $0x8] sm:$0xff]  ;;  %v263_v24 = vld [vmem:[#allocation7] sm:$0xff] }
  0x40   : > { %s941_s15 = sld [smem:[#allocation3 + %s242_s14]]  ;;  %s252_s18 = sadd.s32 6, %s507_s27  ;;  %537 = vmatpush3.msra.mxu0 %v276_v3 }
  0x41   : > { %s943_s17 = sld [smem:[#allocation3 + %s247_s16]]  ;;  %s257_s19 = sadd.s32 7, %s507_s27  ;;  %538 = vmatprep.subr.mxu0 %v804_v0 }
  0x42   : > { %s946_s20 = sld [smem:[#allocation3 + %s252_s18]]  ;;  %s224_s10 = scalar_lea.vmem [#allocation4], %s223_s7  ;;  %539 = vmatpush3.msra.mxu0 %v275_v4 }
  0x43   : > { %s948_s8 = sld [smem:[#allocation3 + %s257_s19]]  ;;  %v225_v6 = vld [vmem:[%s224_s10] sm:$0x1]  ;;  %s229_s12 = scalar_lea.vmem [#allocation4], %s228_s9  ;;  %540 = vmatprep.subr.mxu0 %v804_v0 }
  0x44   : > { %v230_v7 = vld [vmem:[%s229_s12] sm:$0x1]  ;;  %s954_s27 = scalar_lea.vmem [#allocation9], %s505_s28  ;;  %s234_s14 = scalar_lea.vmem [#allocation4], %s937_s11  ;;  %541 = vmatpush3.msra.mxu0 %v274_v5 }
  0x45   : > { %226 = vst [vmem:[%s954_s27] sm:$0x1] %v225_v6  ;;  %231 = vst [vmem:[%s954_s27 + $0x1] sm:$0x1] %v230_v7  ;;  %v235_v8 = vld [vmem:[%s234_s14] sm:$0x1]  ;;  %s239_s7 = scalar_lea.vmem [#allocation4], %s939_s13  ;;  %542 = vmatprep.subr.mxu0 %v804_v0 }
  0x46   : > { %v240_v9 = vld [vmem:[%s239_s7] sm:$0x1]  ;;  %s244_s9 = scalar_lea.vmem [#allocation4], %s941_s15  ;;  %236 = vst [vmem:[%s954_s27 + $0x2] sm:$0x1] %v235_v8  ;;  %543 = vmatpush3.msra.mxu0 %v273_v11  ;;  %s511_s15 = sshll.u32 %s862_s0, 7 }
  0x47   : > { %v245_v10 = vld [vmem:[%s244_s9] sm:$0x1]  ;;  %241 = vst [vmem:[%s954_s27 + $0x3] sm:$0x1] %v240_v9  ;;  %s249_s16 = scalar_lea.vmem [#allocation4], %s943_s17  ;;  %544 = vmatprep.subr.mxu0 %v804_v0  ;;  %s376_s17 = sshll.u32 %s954_s27, 4  ;;  %s377_s17 = int_to_ptr.vmem [resolvable:$true] %s376_s17 }
  0x48   : > { %246 = vst [vmem:[%s954_s27 + $0x4] sm:$0x1] %v245_v10  ;;  %v250_v12 = vld [vmem:[%s249_s16] sm:$0x1]  ;;  %s254_s11 = scalar_lea.vmem [#allocation4], %s946_s20  ;;  %545 = vmatpush3.msra.mxu0 %v272_v14  ;;  %s374_s20 = scalar_lea.hbm %s1053_s4, %s511_s15 }
  0x49   : > { %251 = vst [vmem:[%s954_s27 + $0x5] sm:$0x1] %v250_v12  ;;  %v255_v13 = vld [vmem:[%s254_s11] sm:$0x1]  ;;  %s259_s13 = scalar_lea.vmem [#allocation4], %s948_s8  ;;  %546 = vmatprep.subr.mxu0 %v804_v0  ;;  %s358_s8 = scalar_lea.sflag [#allocation6], %s931_s25 }
  0x4a   : > { %256 = vst [vmem:[%s954_s27 + $0x6] sm:$0x1] %v255_v13  ;;  %v260_v15 = vld [vmem:[%s259_s13] sm:$0x1]  ;;  %547 = vmatpush3.msra.mxu0 %v271_v16  ;;  %s697_s10 = scalar_lea.vmem %s377_s17, 128  ;;  %s806_s12 = smov [#allocation9]  }
  0x4b   : > { %261 = vst [vmem:[%s954_s27 + $0x7] sm:$0x1] %v260_v15  ;;  %548 = vmatprep.subr.mxu0 %v804_v0  ;;  %p698_p9 = scmp.ne.s32.totalorder %s377_s17, %s697_s10  ;;  %s701_s14 = sshll.u32 %s806_s12, 4  ;;  %s702_s14 = int_to_ptr.vmem [resolvable:$false] %s701_s14 }
  0x4c   : > { %549 = vmatpush3.msra.mxu0 %v270_v17  ;;  %s703_s7 = scalar_lea.vmem %s702_s14, 256  ;;  %p704_p8 = scmp.lt.s32.totalorder %s377_s17, %s702_s14 }
  0x4d   : > { %550 = vmatprep.subr.mxu0 %v804_v0  ;;  %p699_p10 = pnand %p698_p9, %p879_p5  ;;  %p705_p11 = scmp.lt.s32.totalorder %s703_s7, %s697_s10 }
  0x4e   : > { %551 = vmatpush3.msra.mxu0 %v269_v18 }
  0x4f   : > { %552 = vmatprep.subr.mxu0 %v804_v0  ;;  %p700_p12 = pneg %p699_p10  ;;  %p706_p0 = por %p705_p11, %p704_p8 }
  0x50   : > { %553 = vmatpush3.msra.mxu0 %v268_v19 }
  0x51   : > { %554 = vmatprep.subr.mxu0 %v804_v0  ;;  %p707_p1 = pnand %p706_p0, %p700_p12 }
  0x52   : > { %555 = vmatpush3.msra.mxu0 %v267_v20  ;;  %v262_v25 = vld [vmem:[%s954_s27] sm:$0xff] }
  0x53   : > { %556 = vmatprep.subr.mxu0 %v804_v0 }
  0x54   : > { %557 = vmatpush3.msra.mxu0 %v266_v21 }
  0x55   : > { %558 = vmatprep.subr.mxu0 %v804_v0 }
  0x56   : > { %559 = vmatpush3.msra.mxu0 %v265_v22 }
  0x57   : > { %560 = vmatprep.subr.mxu0 %v804_v0 }
  0x58   : > { %561 = vmatpush3.msra.mxu0 %v264_v23 }
  0x59   : > { %562 = vmatprep.subr.mxu0 %v804_v0 }
  0x5a   : > { %563 = vmatpush3.msra.mxu0 %v263_v24 }
  0x5b   : > { %565 = vmatmul.mubr.f32.vlgmr.msra.gmra.mxu0 %v262_v25 }
  0x5c   : > { %710 = shalt.err (!%p707_p1)
}
  0x5d   : > { %s711_s27 = scalar_lea.hbm %s374_s20, 128  ;;  %s715_s11 = scalar_lea.hbm %s1053_s4, 384 }
  0x5e   : > { %p712_p3 = scmp.ne.s32.totalorder %s374_s20, %s711_s27  ;;  %p716_p13 = scmp.lt.s32.totalorder %s374_s20, %s1053_s4 }
  0x5f   : > { %p717_p7 = scmp.lt.s32.totalorder %s715_s11, %s711_s27 }
  0x60   : > { %p713_p2 = pnand %p712_p3, %p879_p5 }
  0x61   : > { %p718_p6 = por %p717_p7, %p716_p13 }
  0x62   : > { %p714_p4 = pneg %p713_p2 }
  0x64   : > { %p719_p9 = pnand %p718_p6, %p714_p4 }
  0x66   : > { %722 = shalt.err (!%p719_p9)
}
  0x67   : > { %575 = dma.vmem_to_hbm [thread:$0]  (%p879_p5), %s377_s17, 128, %s374_s20, %s358_s8   ;;  %v508_v26 = vld [vmem:[%s1052_s3] ss:$0 sm:$0xff] }
  0x68   : > { %s221_s12 = scalar_lea.vmem [#allocation10], %s505_s28  ;;  %s1013_s9 = scalar_lea.hbm %s1054_s5, %s511_s15 }
  0x69   : > { %s389_s14 = sshll.u32 %s221_s12, 4  ;;  %s363_s16 = scalar_lea.sflag [#allocation11], %s931_s25  ;;  %s390_s14 = int_to_ptr.vmem [resolvable:$true] %s389_s14 }
  0x6a   : > { %s723_s17 = scalar_lea.vmem %s390_s14, 128  ;;  %s807_s20 = smov [#allocation10]  }
  0x6b   : > { %p724_p10 = scmp.ne.s32.totalorder %s390_s14, %s723_s17  ;;  %s727_s28 = sshll.u32 %s807_s20, 4  ;;  %s728_s28 = int_to_ptr.vmem [resolvable:$false] %s727_s28 }
  0x6c   : > { %s729_s8 = scalar_lea.vmem %s728_s28, 256  ;;  %p730_p11 = scmp.lt.s32.totalorder %s390_s14, %s728_s28 }
  0x6d   : > { %p725_p12 = pnand %p724_p10, %p879_p5  ;;  %p731_p0 = scmp.lt.s32.totalorder %s729_s8, %s723_s17 }
  0x6f   : > { %p726_p8 = pneg %p725_p12  ;;  %p732_p1 = por %p731_p0, %p730_p11 }
  0x71   : > { %p733_p3 = pnand %p732_p1, %p726_p8 }
 0x11b   : > { %v352_v27 = vpop.f32.mrf.mxu0 }
 0x11c   : > { %v353_v28 = vadd.f32 %v508_v26, %v352_v27 }
 0x11d   : > { %v566_v29 = vpop.f32.mrf.mxu0 }
 0x11e   : > { %356 = vst [vmem:[%s221_s12] sm:$0xff] %v353_v28 }
 0x11f   : > { %736 = shalt.err (!%p733_p3)
}
 0x120   : > { %s737_s0 = scalar_lea.hbm %s1013_s9, 128  ;;  %s741_s11 = scalar_lea.hbm %s1054_s5, 384 }
 0x121   : > { %p738_p2 = scmp.ne.s32.totalorder %s1013_s9, %s737_s0  ;;  %p742_p7 = scmp.lt.s32.totalorder %s1013_s9, %s1054_s5 }
 0x122   : > { %p743_p6 = scmp.lt.s32.totalorder %s741_s11, %s737_s0 }
 0x123   : > { %p739_p4 = pnand %p738_p2, %p879_p5 }
 0x124   : > { %p744_p9 = por %p743_p6, %p742_p7 }
 0x125   : > { %p740_p13 = pneg %p739_p4 }
 0x127   : > { %p745_p10 = pnand %p744_p9, %p740_p13 }
 0x129   : > { %748 = shalt.err (!%p745_p10)
}
 0x12a   : > { %576 = dma.vmem_to_hbm [thread:$0]  (%p879_p5), %s390_s14, 128, %s1013_s9, %s363_s16  }
 0x12b PF: > { %p597_p12 = scmp.ge.s32.totalorder %s797_s24, 2  ;;  %s401_s19 = sand.u32 1, %s785_s21  }
 0x12c   : > { %p1064_p8 = scmp.ne.s32.totalorder %s1057_s6, 0  ;;  %s402_s10 = scalar_lea.sflag [#allocation6], %s401_s19 }
 0x12e   : > { %p587_p11 = pnand %p597_p12, %p1064_p8 }
 0x130   : > { %p588_p0 = pneg %p587_p11 }
 0x132   : > { %776 = dma.done.wait (%p588_p0), %s402_s10, 128  }
 0x133   : > { %778 = vsyncadd (%p588_p0), %s402_s10, 4294967168  ;;  %s411_s12 = scalar_lea.sflag [#allocation11], %s401_s19 }
 0x134   : > { %780 = dma.done.wait (%p588_p0), %s411_s12, 128  }
 0x135   : > { %782 = vsyncadd (%p588_p0), %s411_s12, 4294967168  ;;  %p25_p5 = scmp.ge.s32.totalorder %s866_s26, 5   ;;  %s1065_s21 = smov %s789_s22 }
 0x136   : > { %s1066_s22 = smov %s793_s23  ;;  %s1067_s23 = smov %s877_s29 }
 0x137   : > { %s1068_s24 = smov %s866_s26  ;;  %27 = sbr.rel (!%p25_p5) target bundleno = 12 (0xc), region = 98 }
 0x13c   :  { %416 = vsyncpa [#allocation5], 1 }
 0x13d   :  { %418 = vsyncpa [#allocation5 + $0x1], 1 }
 0x13e   :  { %419 = vsyncpa [#allocation8], 1 }
 0x13f   :  { %420 = vsyncpa [#allocation6], 1 }
 0x140   :  { %422 = vsyncpa [#allocation6 + $0x1], 1 }
 0x141   :  { %423 = vsyncpa [#allocation11], 1 }
 0x142   :  { %425 = vsyncpa [#allocation11 + $0x1], 1 }

</bundles_post_ra>
